<compile_context>
chip_gen: v7x
topology: tpu7x:2x2x1
jax: 0.10.0
libtpu: 0.0.40
codegen_flags: <defaults>
</compile_context>

<pallas_src>
import functools

import jax
import jax.numpy as jnp
from jax import lax
from jax.experimental import pallas as pl
from jax.experimental.pallas import tpu as pltpu


# ----------------------------------------------------------------------------
# Planning helpers (pure Python, static shapes only)
# ----------------------------------------------------------------------------

def _round_up(value, multiple):
    return (value + multiple - 1) // multiple * multiple


def _cdiv(a, b):
    return (a + b - 1) // b


def _physical_vmem_bytes():
    """Physical per-core VMEM (generation aware); conservative fallback."""
    try:
        return int(pltpu.get_tpu_info().vmem_capacity_bytes)
    except Exception:
        return 64 << 20            # v7x per-TensorCore VMEM (smallest of v5e/v6e/v7x)


_PHYS_VMEM = _physical_vmem_bytes()


def _plan_tiles(n_rows, n_frames, itemsize, with_target):
    """Pick a balanced frame tile and an explicit VMEM limit.

    Returns (tk, grid_k, vmem_limit_bytes).
    """
    cap = _PHYS_VMEM
    usable = (cap * 3) // 4                                   # headroom for compiler scratch
    # Resident f32 Gram output (+ f32 target), counted double-buffered to be safe.
    resident = (4 if with_target else 2) * n_rows * n_rows * 4
    tile_budget = max(usable - resident, 2 << 20)

    # Largest multiple-of-128 tk whose double-buffered (n_rows, tk) block fits the budget.
    max_tk = max((tile_budget // max(2 * n_rows * itemsize, 1)) // 128 * 128, 128)

    # Balance tiles so the masked tail of the last tile is < 128 frames.
    fp = _round_up(n_frames, 128)
    n_tiles = _cdiv(fp, max_tk)
    tk = min(_round_up(_cdiv(fp, n_tiles), 128), max_tk)
    grid_k = _cdiv(n_frames, tk)

    need = 2 * n_rows * tk * itemsize + resident + (2 << 20)
    vmem_limit = int(min(cap, max(need, 32 << 20)))
    return tk, grid_k, vmem_limit


# ----------------------------------------------------------------------------
# Kernels
# ----------------------------------------------------------------------------

def _mask_ragged_tail(x, k, n_frames, tile_frames):
    """Zero the columns of the frame tile that lie past the true frame count."""
    if n_frames % tile_frames == 0:
        return x                                              # no ragged tile: no-op
    col = lax.broadcasted_iota(jnp.int32, x.shape, 1)
    limit = n_frames - k * tile_frames                        # >= tile_frames except last step
    return jnp.where(col < limit, x, jnp.zeros((), x.dtype))


def _gram_kernel(x_ref, g_ref, *, inv_f, n_frames, tile_frames):
    """Accumulate X_tile @ X_tile.T directly into the resident Gram output."""
    k = pl.program_id(0)

    @pl.when(k == 0)
    def _init():
        g_ref[...] = jnp.zeros_like(g_ref)

    x = _mask_ragged_tail(x_ref[...], k, n_frames, tile_frames)   # native dtype -> MXU
    g_ref[...] += lax.dot_general(
        x, x,
        dimension_numbers=(((1,), (1,)), ((), ())),           # contract last dim of both
        preferred_element_type=jnp.float32,
    )

    @pl.when(k == pl.num_programs(0) - 1)
    def _finalize():
        g_ref[...] = g_ref[...] * jnp.float32(inv_f)


def _gram_mse_kernel(x_ref, tgt_ref, g_ref, loss_ref, *, inv_f, inv_n2,
                     n_frames, tile_frames):
    """Gram accumulation + MSE(G, target) emitted on the last reduction step."""
    k = pl.program_id(0)

    @pl.when(k == 0)
    def _init():
        g_ref[...] = jnp.zeros_like(g_ref)

    x = _mask_ragged_tail(x_ref[...], k, n_frames, tile_frames)
    g_ref[...] += lax.dot_general(
        x, x,
        dimension_numbers=(((1,), (1,)), ((), ())),
        preferred_element_type=jnp.float32,
    )

    @pl.when(k == pl.num_programs(0) - 1)
    def _finalize():
        g = g_ref[...] * jnp.float32(inv_f)
        g_ref[...] = g
        diff = g - tgt_ref[...].astype(jnp.float32)
        loss_ref[0, 0] = jnp.sum(diff * diff) * jnp.float32(inv_n2)


# ----------------------------------------------------------------------------
# Wrappers
# ----------------------------------------------------------------------------

@jax.jit
def _gram_only(x2):
    """x2: (N, F) -> G = x2 @ x2.T / F, shape (N, N), float32.  No padding."""
    n, f = x2.shape
    itemsize = jnp.dtype(x2.dtype).itemsize
    tk, grid_k, vmem_limit = _plan_tiles(n, f, itemsize, with_target=False)

    return pl.pallas_call(
        functools.partial(_gram_kernel, inv_f=1.0 / float(f),
                          n_frames=f, tile_frames=tk),
        out_shape=jax.ShapeDtypeStruct((n, n), jnp.float32),
        grid_spec=pltpu.PrefetchScalarGridSpec(
            num_scalar_prefetch=0,
            grid=(grid_k,),
            in_specs=[pl.BlockSpec((n, tk), lambda k: (0, k))],
            out_specs=pl.BlockSpec((n, n), lambda k: (0, 0)),
        ),
        compiler_params=pltpu.CompilerParams(
            dimension_semantics=("arbitrary",),               # frame axis is a reduction
            vmem_limit_bytes=vmem_limit,                      # always explicit (v5e default is 16 MiB)
        ),
    )(x2)


@jax.jit
def _gram_and_loss(x2, target_gram):
    """x2: (N, F), target_gram: (N, N) f32.  Returns (G, mse(G, target))."""
    n, f = x2.shape
    itemsize = jnp.dtype(x2.dtype).itemsize
    tk, grid_k, vmem_limit = _plan_tiles(n, f, itemsize, with_target=True)

    g, loss = pl.pallas_call(
        functools.partial(_gram_mse_kernel,
                          inv_f=1.0 / float(f),
                          inv_n2=1.0 / float(n * n),
                          n_frames=f, tile_frames=tk),
        out_shape=(
            jax.ShapeDtypeStruct((n, n), jnp.float32),
            jax.ShapeDtypeStruct((1, 1), jnp.float32),
        ),
        grid_spec=pltpu.PrefetchScalarGridSpec(
            num_scalar_prefetch=0,
            grid=(grid_k,),
            in_specs=[
                pl.BlockSpec((n, tk), lambda k: (0, k)),      # frame tiles of X
                pl.BlockSpec((n, n), lambda k: (0, 0)),       # cached f32 target Gram
            ],
            out_specs=[
                pl.BlockSpec((n, n), lambda k: (0, 0)),       # resident Gram accumulator
                pl.BlockSpec(memory_space=pltpu.MemorySpace.SMEM),  # scalar loss in SMEM
            ],
        ),
        compiler_params=pltpu.CompilerParams(
            dimension_semantics=("arbitrary",),
            vmem_limit_bytes=vmem_limit,
        ),
    )(x2, target_gram)
    return g, loss[0, 0]


def gram_matrix(x):
    """GramMatrix for x of shape (batch, Num_feature, n_Frame)."""
    b, c, f = x.shape
    return _gram_only(x.reshape(b * c, f))


class StyleLoss:
    """JAX/Pallas equivalent of the PyTorch StyleLoss module."""

    def __init__(self, target_feature):
        # self.target = GramMatrix(target_feature).detach()  (cached once, f32)
        self.target = jax.block_until_ready(gram_matrix(target_feature))
        self.loss = None

    def __call__(self, x):
        b, c, f = x.shape
        x2 = x.reshape(b * c, f)
        _, self.loss = _gram_and_loss(x2, self.target)
        return x  # forward returns its input unchanged


# ----------------------------------------------------------------------------
# Self-test
# ----------------------------------------------------------------------------

if __name__ == "__main__":
    # Small shapes consistent with (batch, Num_feature, n_Frame).
    # n_Frame deliberately NOT a multiple of 128 to exercise the in-kernel
    # ragged-frame masking path (no wrapper padding exists anymore).
    B, C, F = 2, 4, 200

    key = jax.random.PRNGKey(0)
    k_tgt, k_in, k_in2 = jax.random.split(key, 3)
    target_feature = jax.random.normal(k_tgt, (B, C, F), dtype=jnp.float32)
    input_feature = jax.random.normal(k_in, (B, C, F), dtype=jnp.float32)

    module = StyleLoss(target_feature)
    out = jax.block_until_ready(module(input_feature))
    loss = jax.block_until_ready(module.loss)

    # Pure-JAX reference of the forward semantics.
    def ref_gram(x):
        b, c, f = x.shape
        feat = x.reshape(b * c, f).astype(jnp.float32)
        return (feat @ feat.T) / f

    g_ref_tgt = ref_gram(target_feature)
    g_ref_in = ref_gram(input_feature)
    loss_ref = jnp.mean((g_ref_in - g_ref_tgt) ** 2)

    assert out.shape == input_feature.shape
    assert jnp.allclose(out, input_feature)
    assert jnp.allclose(module.target, g_ref_tgt, atol=5e-4, rtol=5e-4)
    assert jnp.allclose(loss, loss_ref, atol=5e-4, rtol=5e-4), (float(loss), float(loss_ref))

    # Second forward with a different n_Frame (different tile / mask remainder);
    # the Gram stays (B*C, B*C) so it is still comparable to the cached target.
    F2 = 333
    input_feature2 = jax.random.normal(k_in2, (B, C, F2), dtype=jnp.float32)
    out2 = jax.block_until_ready(module(input_feature2))
    loss2 = jax.block_until_ready(module.loss)
    g_ref_in2 = ref_gram(input_feature2)
    loss_ref2 = jnp.mean((g_ref_in2 - g_ref_tgt) ** 2)

    assert out2.shape == input_feature2.shape
    assert jnp.allclose(out2, input_feature2)
    assert jnp.allclose(loss2, loss_ref2, atol=5e-4, rtol=5e-4), (float(loss2), float(loss_ref2))

    print("KERNEL_OK")
</pallas_src>

<mosaic_0001>
module attributes {stable_mosaic.version = 11 : i64} {
  func.func @_gram_kernel(%arg0: i32, %arg1: memref<8x256xf32, #tpu.memory_space<vmem>>, %arg2: memref<8x8xf32, #tpu.memory_space<vmem>>) attributes {dimension_semantics = [#tpu.dimension_semantics<arbitrary>], iteration_bounds = array<i64: 1>, scalar_prefetch = 0 : i64, scratch_operands = 0 : i64, tpu.core_type = #tpu.core_type<tc>, window_params = [{transform_indices = @transform_0, window_bounds = array<i64: 8, 256>}, {pipeline_mode = #tpu.pipeline_mode<synchronous>, transform_indices = @transform_1, window_bounds = array<i64: 8, 8>}]} {
    %c0_i32 = arith.constant 0 : i32
    %0 = arith.cmpi eq, %arg0, %c0_i32 : i32
    %1 = arith.extui %0 : i1 to i32
    %c0_i32_0 = arith.constant 0 : i32
    %2 = arith.cmpi ne, %1, %c0_i32_0 : i32
    scf.if %2 {
      %cst_9 = arith.constant 0.000000e+00 : f32
      %18 = vector.broadcast %cst_9 : f32 to vector<8x8xf32>
      %c0_10 = arith.constant 0 : index
      %c0_11 = arith.constant 0 : index
      %19 = vector.load %arg2[%c0_10, %c0_11] : memref<8x8xf32, #tpu.memory_space<vmem>>, vector<8x8xf32>
      tpu.vector_store %arg2[%c0_10, %c0_11], %18 {strides = array<i32>} : memref<8x8xf32, #tpu.memory_space<vmem>>, vector<8x8xf32>,
    } else {
    }
    %c0 = arith.constant 0 : index
    %c0_1 = arith.constant 0 : index
    %3 = vector.load %arg1[%c0, %c0_1] : memref<8x256xf32, #tpu.memory_space<vmem>>, vector<8x256xf32>
    %4 = tpu.iota {dimensions = array<i32: 1>} : vector<8x256xi32>
    %c256_i32 = arith.constant 256 : i32
    %5 = arith.muli %arg0, %c256_i32 : i32
    %c200_i32 = arith.constant 200 : i32
    %6 = arith.subi %c200_i32, %5 : i32
    %7 = vector.broadcast %6 : i32 to vector<8x256xi32>
    %8 = arith.cmpi slt, %4, %7 : vector<8x256xi32>
    %cst = arith.constant 0.000000e+00 : f32
    %9 = vector.broadcast %cst : f32 to vector<8x256xf32>
    %10 = arith.select %8, %3, %9 : vector<8x256xi1>, vector<8x256xf32>
    %c0_2 = arith.constant 0 : index
    %c0_3 = arith.constant 0 : index
    %11 = vector.load %arg2[%c0_2, %c0_3] : memref<8x8xf32, #tpu.memory_space<vmem>>, vector<8x8xf32>
    %cst_4 = arith.constant dense<0.000000e+00> : vector<8x8xf32>
    %12 = tpu.matmul %10, %10, %cst_4 {dimension_numbers = #tpu.dot_dimension_numbers<[1], [1], [0], [0], [0, 0, 1, 0], [], []>} : vector<8x256xf32>, vector<8x256xf32>, vector<8x8xf32> -> vector<8x8xf32>
    %13 = arith.addf %11, %12 : vector<8x8xf32>
    %c0_5 = arith.constant 0 : index
    %c0_6 = arith.constant 0 : index
    %14 = vector.load %arg2[%c0_5, %c0_6] : memref<8x8xf32, #tpu.memory_space<vmem>>, vector<8x8xf32>
    tpu.vector_store %arg2[%c0_5, %c0_6], %13 {strides = array<i32>} : memref<8x8xf32, #tpu.memory_space<vmem>>, vector<8x8xf32>,
    %c0_i32_7 = arith.constant 0 : i32
    %15 = arith.cmpi eq, %arg0, %c0_i32_7 : i32
    %16 = arith.extui %15 : i1 to i32
    %c0_i32_8 = arith.constant 0 : i32
    %17 = arith.cmpi ne, %16, %c0_i32_8 : i32
    scf.if %17 {
      %c0_9 = arith.constant 0 : index
      %c0_10 = arith.constant 0 : index
      %18 = vector.load %arg2[%c0_9, %c0_10] : memref<8x8xf32, #tpu.memory_space<vmem>>, vector<8x8xf32>
      %cst_11 = arith.constant 5.000000e-03 : f32
      %19 = vector.broadcast %cst_11 : f32 to vector<8x8xf32>
      %20 = arith.mulf %18, %19 : vector<8x8xf32>
      %c0_12 = arith.constant 0 : index
      %c0_13 = arith.constant 0 : index
      %21 = vector.load %arg2[%c0_12, %c0_13] : memref<8x8xf32, #tpu.memory_space<vmem>>, vector<8x8xf32>
      tpu.vector_store %arg2[%c0_12, %c0_13], %20 {strides = array<i32>} : memref<8x8xf32, #tpu.memory_space<vmem>>, vector<8x8xf32>,
    } else {
    }
    return
  }
  func.func @transform_0(%arg0: i32) -> (i32, i32) {
    %c0_i32 = arith.constant 0 : i32
    %c0_i32_0 = arith.constant 0 : i32
    return %c0_i32, %arg0 : i32, i32
  }
  func.func @transform_1(%arg0: i32) -> (i32, i32) {
    %c0_i32 = arith.constant 0 : i32
    %c0_i32_0 = arith.constant 0 : i32
    %c0_i32_1 = arith.constant 0 : i32
    return %c0_i32, %c0_i32_0 : i32, i32
  }
}

</mosaic_0001>

<bundles_post_ra>
// kernel: _gram_only.1
= control target key start
LH: loop header
LB: loop body
LE: loop exit
PB: predicated region body
PF: predicated region fallthrough
CT: control target
= control target key end

     0   :  { %6 = vsyncpa [#allocation3], 0  ;;  %s227_s0 = inlined_call_operand.hbm [shape: f32[8,200], index: 0, kind: input, shape index: {}]   ;;  %s228_s1 = inlined_call_operand.hbm [shape: f32[8,8], index: 1, kind: output, shape index: {}]  }
   0x1   :  { %7 = vsyncpa [#allocation4], 0  ;;  %s187_s6 = smov [#allocation2]   ;;  %s139_s10 = scalar_lea.hbm %s227_s0, 256 }
   0x2   :  { %s14_s7 = sshll.u32 %s187_s6, 4  ;;  %p140_p0 = scmp.ne.s32.totalorder %s227_s0, %s139_s10  ;;  %s15_s7 = int_to_ptr.vmem [resolvable:$true] %s14_s7 }
   0x3   :  { %p143_p1 = scmp.lt.u32.totalorder %s139_s10, %s227_s0 }
   0x5   :  { %p145_p2 = pnand %p143_p1, %p140_p0 }
   0x7   :  { %148 = shalt.err (!%p145_p2)
}
   0x8   :  { %s149_s15 = scalar_lea.vmem %s15_s7, 256  ;;  %p154_p4 = scmp.lt.s32.totalorder %s15_s7, %s15_s7 }
   0x9   :  { %p150_p3 = scmp.ne.s32.totalorder %s15_s7, %s149_s15  ;;  %p155_p5 = scmp.lt.s32.totalorder %s149_s15, %s149_s15 }
   0xb   :  { %p156_p6 = por %p155_p5, %p154_p4 }
   0xd   :  { %p157_p7 = pnand %p156_p6, %p150_p3 }
   0xf   :  { %160 = shalt.err (!%p157_p7)
}
  0x10   :  { %17 = dma.hbm_to_vmem [thread:$0]  %s227_s0, 256, %s15_s7, [#allocation3]  }
  0x11   :  { %183 = dma.done.wait [#allocation3], 256  }
  0x12   :  { %184 = vsyncadd [#allocation3], 4294967040  ;;  %v29_v0 = vlaneseq  ;;  %vm25_vm0 = vcmask 64512   ;;  %v188_v1 = vmov 0.0   ;;  %v28_v4 = vld [vmem:[#allocation2 + $0x8] sm:$0xff]  ;;  %v27_v5 = vld [vmem:[#allocation2] sm:$0xff] }
  0x13   :  { %26 = vst.msk [vmem:[#allocation5] sm:$0xff] %vm25_vm0, %v188_v1  ;;  %s189_s0 = smov [#allocation5]  }
  0x14   :  { %v30_v2 = vand.u32 127, %v29_v0  ;;  %s125_s18 = sshll.u32 %s189_s0, 4  ;;  %s126_s18 = int_to_ptr.vmem [resolvable:$true] %s125_s18 }
  0x15   :  { %s161_s19 = scalar_lea.vmem %s126_s18, 128  ;;  %p166_p9 = scmp.lt.s32.totalorder %s126_s18, %s126_s18 }
  0x16   :  { %v31_v3 = vadd.s32 128, %v30_v2  ;;  %p162_p8 = scmp.ne.s32.totalorder %s126_s18, %s161_s19  ;;  %p167_p10 = scmp.lt.s32.totalorder %s161_s19, %s161_s19 }
  0x18   :  { %vm36_vm1 = vcmp.lt.s32.totalorder %v31_v3, 200  ;;  %p168_p11 = por %p167_p10, %p166_p9 }
  0x19   :  { %134 = vmatprep.subr.msk.mxu0 %vm36_vm1, %v28_v4  ;;  %135 = vmatprep.mubr.msk.f32.mxu0 %vm36_vm1, %v28_v4 }
  0x1a   :  { %41 = vmatpush1.xpose.msra.mxu0 %v27_v5  ;;  %v39_v6 = vld [vmem:[#allocation5] sm:$0xff]  ;;  %p169_p12 = pnand %p168_p11, %p162_p8 }
  0x1d   :  { %105 = vmatmul.mubr.f32.vlgmr.msra.gmra.mrb[0].mxu0 %v27_v5 }
  0xf0   :  { %v106_v7 = vpop.f32.mrb[0].mxu0 }
  0xf1   :  { %v110_v8 = vadd.f32 %v106_v7, %v39_v6  ;;  %v108_v9 = vpop.f32.mrb[1].mxu0 }
  0xf3   :  { %112 = vst.msk [vmem:[#allocation5] sm:$0xff] %vm25_vm0, %v110_v8 }
  0xfa   :  { %v116_v10 = vld [vmem:[#allocation5] sm:$0xff] }
  0xfb   :  { %v117_v11 = vmul.f32 0.005, %v116_v10 }
  0xfd   :  { %118 = vst.msk [vmem:[#allocation5] sm:$0xff] %vm25_vm0, %v117_v11 }
  0xfe   :  { %172 = shalt.err (!%p169_p12)
}
  0xff   :  { %s173_s22 = scalar_lea.hbm %s228_s1, 128 }
 0x100   :  { %p174_p13 = scmp.ne.s32.totalorder %s228_s1, %s173_s22  ;;  %p177_p0 = scmp.lt.u32.totalorder %s173_s22, %s228_s1 }
 0x102   :  { %p179_p1 = pnand %p177_p0, %p174_p13 }
 0x104   :  { %182 = shalt.err (!%p179_p1)
}
 0x105   :  { %128 = dma.vmem_to_hbm [thread:$0]  %s126_s18, 128, %s228_s1, [#allocation4]  }
 0x106   :  { %185 = dma.done.wait [#allocation4], 128  }
 0x107   :  { %186 = vsyncadd [#allocation4], 4294967168 }
 0x108   :  { %132 = vsyncpa [#allocation3], 1 }
 0x109   :  { %133 = vsyncpa [#allocation4], 1 }

</bundles_post_ra>
